<compile_context>
chip_gen: v7x
topology: tpu7x:2x2x1
jax: 0.10.0
libtpu: 0.0.40
codegen_flags: <defaults>
</compile_context>

<pallas_src>
import functools

import numpy as np

import jax
import jax.numpy as jnp
from jax.experimental import pallas as pl
from jax.experimental.pallas import tpu as pltpu

N_SHP = 40
N_EXP = 10
N_PARAM = 62
K_RAW = 3 * (N_SHP + N_EXP) + 3 + 1        # 154 "delta" coefficients per row
K_PAD = 160                                # padded K (multiple of 8)
DEFAULT_MAX_TILE_L = 16384                 # streaming-path lanes per grid step


def _round_up(x, m):
    return ((x + m - 1) // m) * m


def _cdiv(a, b):
    return -(-a // b)


# --------------------------------------------------------------------------
# glue: parameter un-whitening / parsing and delta-LHS construction (tiny JAX)
# --------------------------------------------------------------------------
def _parse_param_batch(param):
    n = param.shape[0]
    p_ = param[:, :12].reshape(n, 3, 4)
    p = p_[:, :, :3]                      # (n, 3, 3) rotation-ish
    offset = p_[:, :, 3:]                 # (n, 3, 1) translation
    alpha_shp = param[:, 12:52].reshape(n, N_SHP, 1)
    alpha_exp = param[:, 52:62].reshape(n, N_EXP, 1)
    return p, offset, alpha_shp, alpha_exp


def _build_delta_lhs(inp, tgt, param_mean, param_std):
    """Builds B (3N, 154) such that diff[(n,r), l] = B[(n,r), :] @ slab[:, l]."""
    n = inp.shape[0]
    param = inp * param_std + param_mean
    param_gt = tgt * param_std + param_mean
    p, offset, a_shp, a_exp = _parse_param_batch(param)
    pg, offsetg, ag_shp, ag_exp = _parse_param_batch(param_gt)
    offset = offset.at[:, -1].set(offsetg[:, -1])          # z-offset override

    a_cat = jnp.concatenate([a_shp[..., 0], a_exp[..., 0]], axis=1)     # (n,50)
    ag_cat = jnp.concatenate([ag_shp[..., 0], ag_exp[..., 0]], axis=1)  # (n,50)
    coef = (pg[..., None] * ag_cat[:, None, None, :]
            - p[..., None] * a_cat[:, None, None, :])                   # (n,3,3,50)
    coef = coef.reshape(n, 3, 3 * (N_SHP + N_EXP))                      # (n,3,150)
    du = pg - p                                                         # (n,3,3)
    doff = (offsetg - offset)[..., 0]                                   # (n,3)
    b = jnp.concatenate([coef, du, doff[..., None]], axis=-1)           # (n,3,154)
    # Keep f32: the delta coefficients are small differences of similar-
    # magnitude terms and are the quantity the whole loss is built from.
    return b.reshape(3 * n, K_RAW).astype(jnp.float32)


# --------------------------------------------------------------------------
# Pallas kernel 1 (default): quadratic form  ssd = sum((B @ G) * B)
# --------------------------------------------------------------------------
def _vdc_gram_kernel(b_ref, g_ref, out_ref):
    b = b_ref[...]                                                      # (MP,KP) f32
    bg = jnp.dot(b, g_ref[...], preferred_element_type=jnp.float32)    # (MP,KP)
    partial = jnp.sum(bg * b)
    out_ref[...] = jnp.zeros(out_ref.shape, out_ref.dtype) + partial


@functools.partial(jax.jit, static_argnums=(5,))
def _vdc_loss_gram(inp, tgt, param_mean, param_std, gram, n_vert):
    n = inp.shape[0]
    kp = gram.shape[0]
    b = _build_delta_lhs(inp, tgt, param_mean, param_std)
    mp = _round_up(3 * n, 8)
    b = jnp.pad(b, ((0, mp - 3 * n), (0, kp - K_RAW)))

    out = pl.pallas_call(
        _vdc_gram_kernel,
        out_shape=jax.ShapeDtypeStruct((8, 128), jnp.float32),
        grid_spec=pltpu.PrefetchScalarGridSpec(
            num_scalar_prefetch=0,
            grid=(1,),
            in_specs=[
                pl.BlockSpec((mp, kp), lambda i: (0, 0)),
                pl.BlockSpec((kp, kp), lambda i: (0, 0)),
            ],
            out_specs=pl.BlockSpec((8, 128), lambda i: (0, 0)),
        ),
        compiler_params=pltpu.CompilerParams(
            dimension_semantics=("arbitrary",),
        ),
    )(b, gram)

    ssd = out[0, 0]
    return ssd / jnp.float32(3 * n * n_vert)


# --------------------------------------------------------------------------
# Pallas kernel 2 (fallback / validation): streamed slab, tiled over L
# --------------------------------------------------------------------------
def _vdc_stream_kernel(b_ref, slab_ref, out_ref):
    # slab block is one contiguous (KP, TL) slice; upcast bf16 -> f32 on the
    # VPU (hidden under the DMA), then one MXU contraction + square-reduce.
    slab = slab_ref[0].astype(jnp.float32)                              # (KP,TL)
    d = jnp.dot(b_ref[...], slab, preferred_element_type=jnp.float32)   # (MP,TL)
    partial = jnp.sum(d * d)
    out_ref[...] = jnp.zeros(out_ref.shape, out_ref.dtype) + partial


@functools.partial(jax.jit, static_argnums=(5,))
def _vdc_loss_stream(inp, tgt, param_mean, param_std, slab3, n_vert):
    n = inp.shape[0]
    grid_l, kp, tile_l = slab3.shape
    b = _build_delta_lhs(inp, tgt, param_mean, param_std)
    mp = _round_up(3 * n, 8)
    b = jnp.pad(b, ((0, mp - 3 * n), (0, kp - K_RAW)))

    partials = pl.pallas_call(
        _vdc_stream_kernel,
        out_shape=jax.ShapeDtypeStruct((grid_l, 8, 128), jnp.float32),
        grid_spec=pltpu.PrefetchScalarGridSpec(
            num_scalar_prefetch=0,
            grid=(grid_l,),
            in_specs=[
                pl.BlockSpec((mp, kp), lambda i: (0, 0)),          # resident
                pl.BlockSpec((1, kp, tile_l), lambda i: (i, 0, 0)),  # streamed
            ],
            out_specs=pl.BlockSpec((1, 8, 128), lambda i: (i, 0, 0)),
        ),
        compiler_params=pltpu.CompilerParams(
            dimension_semantics=("parallel",),
            vmem_limit_bytes=48 * 1024 * 1024,
        ),
    )(b, slab3)

    ssd = jnp.sum(partials[:, 0, 0])
    return ssd / jnp.float32(3 * n * n_vert)


# --------------------------------------------------------------------------
# Wrapper: VDCLoss forward (opt_style='all')
# --------------------------------------------------------------------------
class VDCLoss:
    """Input and target are 62-d params. Only opt_style='all' is implemented."""

    def __init__(self, u, param_mean, param_std, w_shp, w_exp, keypoints,
                 opt_style="all", basis_dtype=jnp.bfloat16,
                 max_tile_l=DEFAULT_MAX_TILE_L, use_gram=True):
        assert max_tile_l % 128 == 0
        self.u = jnp.asarray(u, jnp.float32)                  # (3L, 1)
        self.param_mean = jnp.asarray(param_mean, jnp.float32)
        self.param_std = jnp.asarray(param_std, jnp.float32)
        self.w_shp = jnp.asarray(w_shp, jnp.float32)          # (3L, 40)
        self.w_exp = jnp.asarray(w_exp, jnp.float32)          # (3L, 10)
        self.keypoints = jnp.asarray(keypoints)
        self.u_base = self.u[self.keypoints]
        self.w_shp_base = self.w_shp[self.keypoints]
        self.w_exp_base = self.w_exp[self.keypoints]
        self.w_shp_length = self.w_shp.shape[0] // 3
        self.opt_style = opt_style
        self.use_gram = use_gram

        nv = self.w_shp_length

        # ---- build fused RHS slab [Wx;Wy;Wz;u;ones] of shape (154, L) on
        # host in float64 (used both for the Gram matrix and, in f32/bf16,
        # for the streaming fallback) --------------------------------------
        u_np = np.asarray(u, np.float64).reshape(-1, 1)
        wshp_np = np.asarray(w_shp, np.float64)
        wexp_np = np.asarray(w_exp, np.float64)
        u_r = u_np.reshape(nv, 3).T                                   # (3, L)
        wshp_r = wshp_np.reshape(nv, 3, N_SHP).transpose(1, 2, 0)     # (3,40,L)
        wexp_r = wexp_np.reshape(nv, 3, N_EXP).transpose(1, 2, 0)     # (3,10,L)
        rows = []
        for c in range(3):
            rows.append(wshp_r[c])
            rows.append(wexp_r[c])
        rows.append(u_r)
        rows.append(np.ones((1, nv), np.float64))
        slab64 = np.concatenate(rows, axis=0)                         # (154, L)

        # ---- Gram matrix G = slab slab^T in float64 (once), stored f32 ----
        g64 = slab64 @ slab64.T                                       # (154,154)
        g_pad = np.zeros((K_PAD, K_PAD), np.float64)
        g_pad[:K_RAW, :K_RAW] = g64
        self._gram = jnp.asarray(g_pad, jnp.float32)

        # ---- streaming-path slab: minimal padding, contiguous per-tile ----
        grid_l = max(1, _cdiv(nv, max_tile_l))
        if grid_l > 1 and grid_l % 2 == 1:
            grid_l += 1          # even grid so v7x's 2 TCs split 'parallel' evenly
        tile_l = _round_up(_cdiv(nv, grid_l), 128)
        l_pad = grid_l * tile_l
        slab_pad = np.zeros((K_PAD, l_pad), np.float32)
        slab_pad[:K_RAW, :nv] = slab64.astype(np.float32)   # explicit zero tail
        slab3 = slab_pad.reshape(K_PAD, grid_l, tile_l).transpose(1, 0, 2)
        self._slab = jnp.asarray(slab3, basis_dtype)        # (grid_l, 160, tile_l)
        self._tile_l = tile_l
        self._grid_l = grid_l

    # default (Gram quadratic-form) path
    def forward_all(self, inp, tgt):
        if self.use_gram:
            return _vdc_loss_gram(inp, tgt, self.param_mean, self.param_std,
                                  self._gram, self.w_shp_length)
        return self.forward_all_streaming(inp, tgt)

    # streaming fallback (kept for validation of the Gram path)
    def forward_all_streaming(self, inp, tgt):
        return _vdc_loss_stream(inp, tgt, self.param_mean, self.param_std,
                                self._slab, self.w_shp_length)

    def forward(self, inp, tgt):
        if self.opt_style == "all":
            return self.forward_all(inp, tgt)
        # TODO(synk): forward_resample uses torch.randperm-based row resampling;
        # only the default 'all' path is implemented here.
        raise Exception(f"Unknown opt style: {self.opt_style}")


# --------------------------------------------------------------------------
# Pure-JAX reference (mirrors the PyTorch math) for correctness check
# --------------------------------------------------------------------------
def _ref_vdc_loss(inp, tgt, u, w_shp, w_exp, param_mean, param_std):
    n = inp.shape[0]
    param = inp * param_std + param_mean
    param_gt = tgt * param_std + param_mean
    p, offset, a_shp, a_exp = _parse_param_batch(param)
    pg, offsetg, ag_shp, ag_exp = _parse_param_batch(param_gt)
    offset = offset.at[:, -1].set(offsetg[:, -1])

    gt_vertex = pg @ jnp.transpose(
        (u + w_shp @ ag_shp + w_exp @ ag_exp).reshape(n, -1, 3), (0, 2, 1)) + offsetg
    vertex = p @ jnp.transpose(
        (u + w_shp @ a_shp + w_exp @ a_exp).reshape(n, -1, 3), (0, 2, 1)) + offset
    return jnp.mean((gt_vertex - vertex) ** 2)


if __name__ == "__main__":
    key = jax.random.PRNGKey(0)
    k = jax.random.split(key, 8)

    N = 4          # batch
    L = 1000       # number of 3D vertices  -> u/w_shp/w_exp have 3*L rows

    u = jax.random.normal(k[0], (3 * L, 1), jnp.float32)
    w_shp = 0.1 * jax.random.normal(k[1], (3 * L, N_SHP), jnp.float32)
    w_exp = 0.1 * jax.random.normal(k[2], (3 * L, N_EXP), jnp.float32)
    param_mean = 0.1 * jax.random.normal(k[3], (N_PARAM,), jnp.float32)
    param_std = jax.random.uniform(k[4], (N_PARAM,), jnp.float32, 0.5, 1.5)
    # 17 synthetic "keypoints" -> 51 row indices (unused by forward_all)
    kp_idx = jnp.arange(17, dtype=jnp.int32) * 7
    keypoints = jnp.stack([3 * kp_idx, 3 * kp_idx + 1, 3 * kp_idx + 2],
                          axis=1).reshape(-1)

    inp = jax.random.normal(k[5], (N, N_PARAM), jnp.float32)
    tgt = jax.random.normal(k[6], (N, N_PARAM), jnp.float32)

    # Small max_tile_l so the streaming fallback exercises a multi-step grid
    # (L=1000 -> grid_l=2, tile_l=512).
    loss_mod = VDCLoss(u, param_mean, param_std, w_shp, w_exp, keypoints,
                       opt_style="all", max_tile_l=512)

    loss_gram = jax.block_until_ready(loss_mod.forward(inp, tgt))
    loss_stream = jax.block_until_ready(loss_mod.forward_all_streaming(inp, tgt))
    ref = jax.block_until_ready(
        _ref_vdc_loss(inp, tgt, u, w_shp, w_exp, param_mean, param_std))

    assert jnp.isfinite(loss_gram), "non-finite loss (gram path)"
    assert jnp.isfinite(loss_stream), "non-finite loss (streaming path)"
    assert jnp.allclose(loss_gram, ref, rtol=3e-2, atol=1e-3), (loss_gram, ref)
    assert jnp.allclose(loss_stream, ref, rtol=3e-2, atol=1e-3), (loss_stream, ref)
    print("KERNEL_OK")
</pallas_src>

<mosaic_0001>
module attributes {stable_mosaic.version = 11 : i64} {
  func.func @_vdc_gram_kernel(%arg0: i32, %arg1: memref<16x160xf32, #tpu.memory_space<vmem>>, %arg2: memref<160x160xf32, #tpu.memory_space<vmem>>, %arg3: memref<8x128xf32, #tpu.memory_space<vmem>>) attributes {dimension_semantics = [#tpu.dimension_semantics<arbitrary>], iteration_bounds = array<i64: 1>, scalar_prefetch = 0 : i64, scratch_operands = 0 : i64, tpu.core_type = #tpu.core_type<tc>, window_params = [{pipeline_mode = #tpu.pipeline_mode<synchronous>, transform_indices = @transform_0, window_bounds = array<i64: 16, 160>}, {pipeline_mode = #tpu.pipeline_mode<synchronous>, transform_indices = @transform_1, window_bounds = array<i64: 160, 160>}, {pipeline_mode = #tpu.pipeline_mode<synchronous>, transform_indices = @transform_2, window_bounds = array<i64: 8, 128>}]} {
    %c0 = arith.constant 0 : index
    %c0_0 = arith.constant 0 : index
    %0 = vector.load %arg1[%c0, %c0_0] : memref<16x160xf32, #tpu.memory_space<vmem>>, vector<16x160xf32>
    %c0_1 = arith.constant 0 : index
    %c0_2 = arith.constant 0 : index
    %1 = vector.load %arg2[%c0_1, %c0_2] : memref<160x160xf32, #tpu.memory_space<vmem>>, vector<160x160xf32>
    %cst = arith.constant dense<0.000000e+00> : vector<16x160xf32>
    %2 = tpu.matmul %0, %1, %cst {dimension_numbers = #tpu.dot_dimension_numbers<[1], [0], [0], [1], [0, 0, 1, 1], [], []>} : vector<16x160xf32>, vector<160x160xf32>, vector<16x160xf32> -> vector<16x160xf32>
    %3 = arith.mulf %2, %0 : vector<16x160xf32>
    %4 = vector.shape_cast %3 : vector<16x160xf32> to vector<1x16x160xf32>
    %cst_3 = arith.constant dense<0.000000e+00> : vector<1xf32>
    %5 = vector.multi_reduction <add>, %4, %cst_3 [1, 2] : vector<1x16x160xf32> to vector<1xf32>
    %6 = vector.shape_cast %5 : vector<1xf32> to vector<1x1x1xf32>
    %7 = vector.extract %6[0, 0, 0] : f32 from vector<1x1x1xf32>
    %cst_4 = arith.constant 0.000000e+00 : f32
    %8 = vector.broadcast %cst_4 : f32 to vector<8x128xf32>
    %9 = vector.broadcast %7 : f32 to vector<8x128xf32>
    %10 = arith.addf %8, %9 : vector<8x128xf32>
    %c0_5 = arith.constant 0 : index
    %c0_6 = arith.constant 0 : index
    %11 = vector.load %arg3[%c0_5, %c0_6] : memref<8x128xf32, #tpu.memory_space<vmem>>, vector<8x128xf32>
    tpu.vector_store %arg3[%c0_5, %c0_6], %10 {strides = array<i32>} : memref<8x128xf32, #tpu.memory_space<vmem>>, vector<8x128xf32>,
    return
  }
  func.func @transform_0(%arg0: i32) -> (i32, i32) {
    %c0_i32 = arith.constant 0 : i32
    %c0_i32_0 = arith.constant 0 : i32
    %c0_i32_1 = arith.constant 0 : i32
    return %c0_i32, %c0_i32_0 : i32, i32
  }
  func.func @transform_1(%arg0: i32) -> (i32, i32) {
    %c0_i32 = arith.constant 0 : i32
    %c0_i32_0 = arith.constant 0 : i32
    %c0_i32_1 = arith.constant 0 : i32
    return %c0_i32, %c0_i32_0 : i32, i32
  }
  func.func @transform_2(%arg0: i32) -> (i32, i32) {
    %c0_i32 = arith.constant 0 : i32
    %c0_i32_0 = arith.constant 0 : i32
    %c0_i32_1 = arith.constant 0 : i32
    return %c0_i32, %c0_i32_0 : i32, i32
  }
}

</mosaic_0001>

<bundles_post_ra>
// kernel: _vdc_loss_gram.1
= control target key start
LH: loop header
LB: loop body
LE: loop exit
PB: predicated region body
PF: predicated region fallthrough
CT: control target
= control target key end

     0   :  { %vm55_vm0 = vcmask 261120   ;;  %s390_s1 = inlined_call_operand.vmem [shape: f32[160,160], index: 1, kind: input, shape index: {}]   ;;  %s391_s0 = inlined_call_operand.vmem [shape: f32[16,160], index: 0, kind: input, shape index: {}]   ;;  %s392_s2 = inlined_call_operand.vmem [shape: f32[8,128], index: 2, kind: output, shape index: {}]  }
   0x1   :  { %v16_v0 = vld [vmem:[%s390_s1 + $0x8] sm:$0xff]  ;;  %v18_v1 = vld [vmem:[%s390_s1 + $0x18] sm:$0xff]  ;;  %v15_v2 = vld [vmem:[%s390_s1] sm:$0xff] }
   0x2   :  { %v166_v3 = vpack.c.bf16 %v18_v1, %v16_v0  ;;  %v17_v4 = vld [vmem:[%s390_s1 + $0x10] sm:$0xff]  ;;  %v20_v5 = vld [vmem:[%s390_s1 + $0x28] sm:$0xff]  ;;  %v22_v6 = vld [vmem:[%s390_s1 + $0x38] sm:$0xff] }
   0x3   :  { %v168_v7 = vpack.c.bf16 %v17_v4, %v15_v2  ;;  %v170_v8 = vpack.c.bf16 %v22_v6, %v20_v5  ;;  %v19_v9 = vld [vmem:[%s390_s1 + $0x20] sm:$0xff]  ;;  %v21_v10 = vld [vmem:[%s390_s1 + $0x30] sm:$0xff]  ;;  %v24_v11 = vld [vmem:[%s390_s1 + $0x48] sm:$0xff] }
   0x4   :  { %167 = vmatprep.subr.bf16.mxu0 %v166_v3  ;;  %206 = vmatprep.subr.bf16.mxu1 %v166_v3  ;;  %v26_v12 = vld [vmem:[%s390_s1 + $0x58] sm:$0xff]  ;;  %v172_v13 = vpack.c.bf16 %v21_v10, %v19_v9  ;;  %v23_v15 = vld [vmem:[%s390_s1 + $0x40] sm:$0xff]  ;;  %v25_v16 = vld [vmem:[%s390_s1 + $0x50] sm:$0xff] }
   0x5   :  { %169 = vmatpush1.bf16.msra.mxu0 %v168_v7  ;;  %216 = vmatpush1.bf16.msra.mxu1 %v168_v7  ;;  %v174_v14 = vpack.c.bf16 %v26_v12, %v24_v11  ;;  %v28_v17 = vld [vmem:[%s390_s1 + $0x68] sm:$0xff]  ;;  %v30_v18 = vld [vmem:[%s390_s1 + $0x78] sm:$0xff]  ;;  %v176_v19 = vpack.c.bf16 %v25_v16, %v23_v15  ;;  %v27_v21 = vld [vmem:[%s390_s1 + $0x60] sm:$0xff] }
   0x6   :  { %171 = vmatprep.subr.bf16.mxu0 %v170_v8  ;;  %207 = vmatprep.subr.bf16.mxu1 %v170_v8  ;;  %v178_v20 = vpack.c.bf16 %v30_v18, %v28_v17  ;;  %v29_v22 = vld [vmem:[%s390_s1 + $0x70] sm:$0xff]  ;;  %v32_v23 = vld [vmem:[%s390_s1 + $0x88] sm:$0xff]  ;;  %v34_v24 = vld [vmem:[%s390_s1 + $0x98] sm:$0xff] }
   0x7   :  { %v180_v25 = vpack.c.bf16 %v29_v22, %v27_v21  ;;  %v182_v26 = vpack.c.bf16 %v34_v24, %v32_v23  ;;  %v31_v27 = vld [vmem:[%s390_s1 + $0x80] sm:$0xff]  ;;  %v33_v28 = vld [vmem:[%s390_s1 + $0x90] sm:$0xff]  ;;  %v306_v29 = vld [vmem:[%s391_s0 + $0x8] sm:$0xff] }
   0x8   :  { %v36_v30 = vld [vmem:[%s390_s1 + $0xa8] sm:$0xff]  ;;  %v38_v31 = vld [vmem:[%s390_s1 + $0xb8] sm:$0xff]  ;;  %164 = vmatprep.mubr.msk.f32.mxu0 %vm55_vm0, %v306_v29  ;;  %v184_v33 = vpack.c.bf16 %v33_v28, %v31_v27  ;;  %v35_v35 = vld [vmem:[%s390_s1 + $0xa0] sm:$0xff] }
   0x9   :  { %173 = vmatpush1.bf16.msra.mxu0 %v172_v13  ;;  %217 = vmatpush1.bf16.msra.mxu1 %v172_v13  ;;  %v319_v32 = vld [vmem:[%s391_s0 + $0x18] sm:$0xff]  ;;  %v186_v34 = vpack.c.bf16 %v38_v31, %v36_v30  ;;  %v37_v36 = vld [vmem:[%s390_s1 + $0xb0] sm:$0xff]  ;;  %v40_v37 = vld [vmem:[%s390_s1 + $0xc8] sm:$0xff] }
   0xa   :  { %175 = vmatprep.subr.bf16.mxu0 %v174_v14  ;;  %208 = vmatprep.subr.bf16.mxu1 %v174_v14  ;;  %v42_v38 = vld [vmem:[%s390_s1 + $0xd8] sm:$0xff]  ;;  %v188_v39 = vpack.c.bf16 %v37_v36, %v35_v35  ;;  %v39_v41 = vld [vmem:[%s390_s1 + $0xc0] sm:$0xff]  ;;  %v41_v42 = vld [vmem:[%s390_s1 + $0xd0] sm:$0xff] }
   0xb   :  { %165 = vmatprep.mubr.msk.f32.mxu1 %vm55_vm0, %v319_v32  ;;  %v190_v40 = vpack.c.bf16 %v42_v38, %v40_v37  ;;  %v44_v43 = vld [vmem:[%s390_s1 + $0xe8] sm:$0xff]  ;;  %v46_v44 = vld [vmem:[%s390_s1 + $0xf8] sm:$0xff]  ;;  %v192_v45 = vpack.c.bf16 %v41_v42, %v39_v41  ;;  %v43_v47 = vld [vmem:[%s390_s1 + $0xe0] sm:$0xff] }
   0xc   :  { %v194_v46 = vpack.c.bf16 %v46_v44, %v44_v43  ;;  %v45_v48 = vld [vmem:[%s390_s1 + $0xf0] sm:$0xff]  ;;  %v48_v49 = vld [vmem:[%s390_s1 + $0x108] sm:$0xff]  ;;  %v50_v50 = vld [vmem:[%s390_s1 + $0x118] sm:$0xff] }
   0xd   :  { %177 = vmatpush1.bf16.msra.mxu0 %v176_v19  ;;  %218 = vmatpush1.bf16.msra.mxu1 %v176_v19  ;;  %v196_v51 = vpack.c.bf16 %v45_v48, %v43_v47  ;;  %v198_v52 = vpack.c.bf16 %v50_v50, %v48_v49  ;;  %v47_v53 = vld [vmem:[%s390_s1 + $0x100] sm:$0xff]  ;;  %v49_v54 = vld [vmem:[%s390_s1 + $0x110] sm:$0xff]  ;;  %v52_v55 = vld [vmem:[%s390_s1 + $0x128] sm:$0xff] }
   0xe   :  { %179 = vmatprep.subr.bf16.mxu0 %v178_v20  ;;  %209 = vmatprep.subr.bf16.mxu1 %v178_v20  ;;  %v54_v56 = vld [vmem:[%s390_s1 + $0x138] sm:$0xff]  ;;  %v200_v57 = vpack.c.bf16 %v49_v54, %v47_v53  ;;  %v51_v59 = vld [vmem:[%s390_s1 + $0x120] sm:$0xff]  ;;  %v53_v60 = vld [vmem:[%s390_s1 + $0x130] sm:$0xff] }
   0xf   :  { %v202_v58 = vpack.c.bf16 %v54_v56, %v52_v55  ;;  %v204_v61 = vpack.c.bf16 %v53_v60, %v51_v59  ;;  %v11_v62 = vld [vmem:[%s391_s0] sm:$0xff]  ;;  %v13_v63 = vld [vmem:[%s391_s0 + $0x10] sm:$0xff] }
  0x11   :  { %181 = vmatpush1.bf16.msra.mxu0 %v180_v25  ;;  %219 = vmatpush1.bf16.msra.mxu1 %v180_v25 }
  0x12   :  { %183 = vmatprep.subr.bf16.mxu0 %v182_v26  ;;  %210 = vmatprep.subr.bf16.mxu1 %v182_v26 }
  0x15   :  { %185 = vmatpush1.bf16.msra.mxu0 %v184_v33  ;;  %220 = vmatpush1.bf16.msra.mxu1 %v184_v33 }
  0x16   :  { %187 = vmatprep.subr.bf16.mxu0 %v186_v34  ;;  %211 = vmatprep.subr.bf16.mxu1 %v186_v34 }
  0x19   :  { %189 = vmatpush1.bf16.msra.mxu0 %v188_v39  ;;  %221 = vmatpush1.bf16.msra.mxu1 %v188_v39 }
  0x1a   :  { %191 = vmatprep.subr.bf16.mxu0 %v190_v40  ;;  %212 = vmatprep.subr.bf16.mxu1 %v190_v40 }
  0x1d   :  { %193 = vmatpush1.bf16.msra.mxu0 %v192_v45  ;;  %222 = vmatpush1.bf16.msra.mxu1 %v192_v45 }
  0x1e   :  { %195 = vmatprep.subr.bf16.mxu0 %v194_v46  ;;  %213 = vmatprep.subr.bf16.mxu1 %v194_v46 }
  0x21   :  { %197 = vmatpush1.bf16.msra.mxu0 %v196_v51  ;;  %223 = vmatpush1.bf16.msra.mxu1 %v196_v51 }
  0x22   :  { %199 = vmatprep.subr.bf16.mxu0 %v198_v52  ;;  %214 = vmatprep.subr.bf16.mxu1 %v198_v52 }
  0x25   :  { %201 = vmatpush1.bf16.msra.mxu0 %v200_v57  ;;  %224 = vmatpush1.bf16.msra.mxu1 %v200_v57 }
  0x26   :  { %203 = vmatprep.subr.bf16.mxu0 %v202_v58  ;;  %215 = vmatprep.subr.bf16.mxu1 %v202_v58 }
  0x29   :  { %205 = vmatpush1.bf16.msra.mxu0 %v204_v61  ;;  %225 = vmatpush1.bf16.msra.mxu1 %v204_v61 }
  0x2c   :  { %127 = vmatmul.mubr.f32.vlgmr.msra.gmra.mrb[0].mxu0 %v11_v62  ;;  %133 = vmatmul.mubr.f32.vlgmr.msra.gmra.mrb[0].mxu1 %v13_v63 }
  0xff   :  { %v128_v0 = vpop.f32.mrb[0].mxu0  ;;  %v134_v1 = vpop.f32.mrb[0].mxu1 }
 0x100   :  { %v130_v2 = vpop.f32.mrb[1].mxu0  ;;  %v136_v3 = vpop.f32.mrb[1].mxu1  ;;  %v139_v6 = vmul.f32 %v128_v0, %v11_v62  ;;  %v141_v7 = vmul.f32 %v134_v1, %v13_v63 }
 0x101   :  { %v140_v4 = vmul.f32 %v130_v2, %v306_v29  ;;  %v142_v5 = vmul.f32 %v136_v3, %v319_v32 }
 0x103   :  { %v143_v8 = vsel %vm55_vm0, %v140_v4, 0.0  ;;  %v146_v10 = vsel %vm55_vm0, %v142_v5, 0.0 }
 0x104   :  { %v144_v9 = vadd.f32 %v143_v8, %v139_v6 }
 0x106   :  { %v145_v11 = vadd.f32 %v144_v9, %v141_v7 }
 0x108   :  { %v147_v12 = vadd.f32 %v146_v10, %v145_v11 }
 0x10a   :  { %148 = vadd.xlane.f32.xlu0 %v147_v12 }
 0x197   :  { %v149_v13 = vpop.xlane.xlu0 %148 }
 0x198   :  { %v150_v14 = vrot.slane %v149_v13, 4 }
 0x19a   :  { %v151_v15 = vadd.f32 %v150_v14, %v149_v13 }
 0x19c   :  { %v152_v16 = vrot.slane %v151_v15, 2 }
 0x19e   :  { %v153_v17 = vadd.f32 %v152_v16, %v151_v15 }
 0x1a0   :  { %v154_v18 = vrot.slane %v153_v17, 1 }
 0x1a2   :  { %v155_v19 = vadd.f32 %v154_v18, %v153_v17 }
 0x1a4   :  { %226 = vpush %v155_v19 }
 0x1d5   :  { %s227_s0 = spop %226 }
 0x1d6   :  { %v157_v20 = vstv %s227_s0 }
 0x1d7   :  { %159 = vst [vmem:[%s392_s2] sm:$0xff] %v157_v20 }

</bundles_post_ra>
